<compile_context>
chip_gen: v6e
topology: v6e:2x2x1
jax: 0.10.0
libtpu: 0.0.40
codegen_flags: <defaults>
</compile_context>

<pallas_src>
import functools

import jax
import jax.numpy as jnp
from jax.experimental import pallas as pl
from jax.experimental.pallas import tpu as pltpu

PAD = 128              # padded lane width of every hidden layer and fused head
DEFAULT_TILE_B = 512   # multiple of 8 (f32 sublane); fits scoped VMEM everywhere
HIDDEN = (128, 64, 32)  # logical hidden widths of the PyTorch module


def _round_up(x, m):
    return (x + m - 1) // m * m


def _dueling_kernel(x_ref,
                    w1_ref, b1_ref,
                    w2_ref, b2_ref,
                    w3_ref, b3_ref,
                    wh_ref, bh_ref,
                    out_ref):
    """Fused trunk + fused (V+A | A) head for one batch tile (128-lane padded)."""
    h = jnp.dot(x_ref[...], w1_ref[...],
                preferred_element_type=jnp.float32) + b1_ref[...]
    h = jnp.maximum(h, 0.0)
    h = jnp.dot(h, w2_ref[...],
                preferred_element_type=jnp.float32) + b2_ref[...]
    h = jnp.maximum(h, 0.0)
    h = jnp.dot(h, w3_ref[...],
                preferred_element_type=jnp.float32) + b3_ref[...]
    h = jnp.maximum(h, 0.0)
    out = jnp.dot(h, wh_ref[...],
                  preferred_element_type=jnp.float32) + bh_ref[...]
    out_ref[...] = out.astype(out_ref.dtype)


@functools.partial(jax.jit, static_argnames=("action_size", "tile_b"))
def dueling_qnetwork_forward(state, packed, action_size, tile_b=DEFAULT_TILE_B):
    """state: (B, state_size) f32.  packed: zero-padded / head-fused params."""
    B, S = state.shape
    tile_b = min(tile_b, _round_up(B, 8))
    Bp = _round_up(B, tile_b)
    if Bp != B:
        state = jnp.pad(state, ((0, Bp - B), (0, 0)))
    n_tiles = Bp // tile_b

    w1, b1 = packed["w1"], packed["b1"]
    w2, b2 = packed["w2"], packed["b2"]
    w3, b3 = packed["w3"], packed["b3"]
    wh, bh = packed["wh"], packed["bh"]

    def const_spec(a):  # whole array, VMEM-resident across all grid steps
        return pl.BlockSpec(a.shape, lambda i: (0, 0))

    flops = 2 * Bp * (S * PAD + 3 * PAD * PAD)
    bytes_accessed = 4 * (Bp * S + Bp * PAD
                          + w1.size + w2.size + w3.size + wh.size
                          + b1.size + b2.size + b3.size + bh.size)

    heads = pl.pallas_call(
        _dueling_kernel,
        out_shape=jax.ShapeDtypeStruct((Bp, PAD), jnp.float32),
        grid=(n_tiles,),
        in_specs=[pl.BlockSpec((tile_b, S), lambda i: (i, 0)),
                  const_spec(w1), const_spec(b1),
                  const_spec(w2), const_spec(b2),
                  const_spec(w3), const_spec(b3),
                  const_spec(wh), const_spec(bh)],
        out_specs=pl.BlockSpec((tile_b, PAD), lambda i: (i, 0)),
        compiler_params=pltpu.CompilerParams(
            dimension_semantics=("parallel",)),
        cost_estimate=pl.CostEstimate(flops=flops, transcendentals=0,
                                      bytes_accessed=bytes_accessed),
    )(state, w1, b1, w2, b2, w3, b3, wh, bh)

    heads = heads[:B]                              # drop batch padding BEFORE the mean
    q_plus_a = heads[:, :action_size]              # already V + A (fused in weights)
    A = heads[:, action_size]                      # advantage column
    # torch.mean(A) (no dim) == scalar mean over the whole batch.
    return q_plus_a - jnp.mean(A)


def init_logical_params(key, state_size, action_size):
    """PyTorch nn.Linear default init (uniform +/- 1/sqrt(fan_in)); (in,out) layout."""
    def linear(k, fan_in, fan_out):
        kw, kb = jax.random.split(k)
        bound = 1.0 / (fan_in ** 0.5)
        w = jax.random.uniform(kw, (fan_in, fan_out), jnp.float32, -bound, bound)
        b = jax.random.uniform(kb, (1, fan_out), jnp.float32, -bound, bound)
        return w, b

    keys = jax.random.split(key, 5)
    dims = [state_size, *HIDDEN]
    p = {}
    for i in range(3):
        p[f"w{i+1}"], p[f"b{i+1}"] = linear(keys[i], dims[i], dims[i + 1])
    p["wV"], p["bV"] = linear(keys[3], HIDDEN[-1], action_size)  # V: 32 -> action_size
    p["wA"], p["bA"] = linear(keys[4], HIDDEN[-1], 1)            # A: 32 -> 1
    return p


def pack_params(logical, state_size, action_size):
    """Zero-pad hidden dims to 128 lanes and fuse the V/A heads into one matmul.

    Head column layout (out of 128 padded lanes):
      columns [0 : action_size]  ->  V_j + A   (V+A recombination fused into weights)
      column  [action_size]      ->  A         (needed for the whole-batch mean)
    """
    H3 = HIDDEN[-1]

    def pad(w, rows, cols):
        return jnp.zeros((rows, cols), jnp.float32).at[:w.shape[0], :w.shape[1]].set(w)

    packed = {
        "w1": pad(logical["w1"], state_size, PAD), "b1": pad(logical["b1"], 1, PAD),
        "w2": pad(logical["w2"], PAD, PAD),        "b2": pad(logical["b2"], 1, PAD),
        "w3": pad(logical["w3"], PAD, PAD),        "b3": pad(logical["b3"], 1, PAD),
    }
    wh = jnp.zeros((PAD, PAD), jnp.float32)
    wh = wh.at[:H3, :action_size].set(logical["wV"] + logical["wA"])   # V_j + A weights
    wh = wh.at[:H3, action_size].set(logical["wA"][:, 0])              # A weights
    bh = jnp.zeros((1, PAD), jnp.float32)
    bh = bh.at[:, :action_size].set(logical["bV"] + logical["bA"])     # bV_j + bA
    bh = bh.at[:, action_size].set(logical["bA"][0, 0])                # bA
    packed["wh"], packed["bh"] = wh, bh
    return packed


def _reference_forward(state, p):
    h = jnp.maximum(state @ p["w1"] + p["b1"], 0.0)
    h = jnp.maximum(h @ p["w2"] + p["b2"], 0.0)
    h = jnp.maximum(h @ p["w3"] + p["b3"], 0.0)
    V = h @ p["wV"] + p["bV"]
    A = h @ p["wA"] + p["bA"]
    return V + (A - jnp.mean(A))


if __name__ == "__main__":
    STATE_SIZE = 8
    ACTION_SIZE = 4

    key = jax.random.PRNGKey(0)
    kp, kx_small, kx_big = jax.random.split(key, 3)

    logical = init_logical_params(kp, STATE_SIZE, ACTION_SIZE)
    packed = pack_params(logical, STATE_SIZE, ACTION_SIZE)

    # Small "act()"-sized batch (B=2): single padded tile.
    state_small = jax.random.normal(kx_small, (2, STATE_SIZE), jnp.float32)
    out_small = jax.block_until_ready(
        dueling_qnetwork_forward(state_small, packed, ACTION_SIZE))
    ref_small = _reference_forward(state_small, logical)
    assert out_small.shape == (2, ACTION_SIZE), out_small.shape
    assert jnp.allclose(out_small, ref_small, atol=1e-4, rtol=1e-4), (
        float(jnp.max(jnp.abs(out_small - ref_small))))

    # Training-sized batch exercising the batch grid + ragged padding (200 -> 4x64 tiles).
    state_big = jax.random.normal(kx_big, (200, STATE_SIZE), jnp.float32)
    out_big = jax.block_until_ready(
        dueling_qnetwork_forward(state_big, packed, ACTION_SIZE, tile_b=64))
    ref_big = _reference_forward(state_big, logical)
    assert out_big.shape == (200, ACTION_SIZE), out_big.shape
    assert jnp.allclose(out_big, ref_big, atol=1e-4, rtol=1e-4), (
        float(jnp.max(jnp.abs(out_big - ref_big))))

    # Default tile path on a larger batch (multiple 512-row tiles).
    state_huge = jax.random.normal(kx_big, (1024, STATE_SIZE), jnp.float32)
    out_huge = jax.block_until_ready(
        dueling_qnetwork_forward(state_huge, packed, ACTION_SIZE))
    ref_huge = _reference_forward(state_huge, logical)
    assert jnp.allclose(out_huge, ref_huge, atol=1e-4, rtol=1e-4), (
        float(jnp.max(jnp.abs(out_huge - ref_huge))))

    print("KERNEL_OK")
</pallas_src>

<mosaic_0001>
module attributes {stable_mosaic.version = 11 : i64} {
  func.func @_dueling_kernel(%arg0: i32, %arg1: memref<8x8xf32, #tpu.memory_space<vmem>>, %arg2: memref<8x128xf32, #tpu.memory_space<vmem>>, %arg3: memref<1x128xf32, #tpu.memory_space<vmem>>, %arg4: memref<128x128xf32, #tpu.memory_space<vmem>>, %arg5: memref<1x128xf32, #tpu.memory_space<vmem>>, %arg6: memref<128x128xf32, #tpu.memory_space<vmem>>, %arg7: memref<1x128xf32, #tpu.memory_space<vmem>>, %arg8: memref<128x128xf32, #tpu.memory_space<vmem>>, %arg9: memref<1x128xf32, #tpu.memory_space<vmem>>, %arg10: memref<8x128xf32, #tpu.memory_space<vmem>>) attributes {dimension_semantics = [#tpu.dimension_semantics<parallel>], iteration_bounds = array<i64: 1>, scalar_prefetch = 0 : i64, scratch_operands = 0 : i64, tpu.core_type = #tpu.core_type<tc>, window_params = [{transform_indices = @transform_0, window_bounds = array<i64: 8, 8>}, {pipeline_mode = #tpu.pipeline_mode<synchronous>, transform_indices = @transform_1, window_bounds = array<i64: 8, 128>}, {pipeline_mode = #tpu.pipeline_mode<synchronous>, transform_indices = @transform_2, window_bounds = array<i64: 1, 128>}, {pipeline_mode = #tpu.pipeline_mode<synchronous>, transform_indices = @transform_3, window_bounds = array<i64: 128, 128>}, {pipeline_mode = #tpu.pipeline_mode<synchronous>, transform_indices = @transform_4, window_bounds = array<i64: 1, 128>}, {pipeline_mode = #tpu.pipeline_mode<synchronous>, transform_indices = @transform_5, window_bounds = array<i64: 128, 128>}, {pipeline_mode = #tpu.pipeline_mode<synchronous>, transform_indices = @transform_6, window_bounds = array<i64: 1, 128>}, {pipeline_mode = #tpu.pipeline_mode<synchronous>, transform_indices = @transform_7, window_bounds = array<i64: 128, 128>}, {pipeline_mode = #tpu.pipeline_mode<synchronous>, transform_indices = @transform_8, window_bounds = array<i64: 1, 128>}, {transform_indices = @transform_9, window_bounds = array<i64: 8, 128>}]} {
    %c0 = arith.constant 0 : index
    %c0_0 = arith.constant 0 : index
    %0 = vector.load %arg1[%c0, %c0_0] : memref<8x8xf32, #tpu.memory_space<vmem>>, vector<8x8xf32>
    %c0_1 = arith.constant 0 : index
    %c0_2 = arith.constant 0 : index
    %1 = vector.load %arg2[%c0_1, %c0_2] : memref<8x128xf32, #tpu.memory_space<vmem>>, vector<8x128xf32>
    %cst = arith.constant dense<0.000000e+00> : vector<8x128xf32>
    %2 = tpu.matmul %0, %1, %cst {dimension_numbers = #tpu.dot_dimension_numbers<[1], [0], [0], [1], [0, 0, 1, 1], [], []>} : vector<8x8xf32>, vector<8x128xf32>, vector<8x128xf32> -> vector<8x128xf32>
    %c0_3 = arith.constant 0 : index
    %c0_4 = arith.constant 0 : index
    %3 = vector.load %arg3[%c0_3, %c0_4] : memref<1x128xf32, #tpu.memory_space<vmem>>, vector<1x128xf32>
    %4 = vector.broadcast %3 : vector<1x128xf32> to vector<8x128xf32>
    %5 = arith.addf %2, %4 : vector<8x128xf32>
    %cst_5 = arith.constant 0.000000e+00 : f32
    %6 = vector.broadcast %cst_5 : f32 to vector<8x128xf32>
    %7 = arith.maximumf %5, %6 : vector<8x128xf32>
    %c0_6 = arith.constant 0 : index
    %c0_7 = arith.constant 0 : index
    %8 = vector.load %arg4[%c0_6, %c0_7] : memref<128x128xf32, #tpu.memory_space<vmem>>, vector<128x128xf32>
    %cst_8 = arith.constant dense<0.000000e+00> : vector<8x128xf32>
    %9 = tpu.matmul %7, %8, %cst_8 {dimension_numbers = #tpu.dot_dimension_numbers<[1], [0], [0], [1], [0, 0, 1, 1], [], []>} : vector<8x128xf32>, vector<128x128xf32>, vector<8x128xf32> -> vector<8x128xf32>
    %c0_9 = arith.constant 0 : index
    %c0_10 = arith.constant 0 : index
    %10 = vector.load %arg5[%c0_9, %c0_10] : memref<1x128xf32, #tpu.memory_space<vmem>>, vector<1x128xf32>
    %11 = vector.broadcast %10 : vector<1x128xf32> to vector<8x128xf32>
    %12 = arith.addf %9, %11 : vector<8x128xf32>
    %cst_11 = arith.constant 0.000000e+00 : f32
    %13 = vector.broadcast %cst_11 : f32 to vector<8x128xf32>
    %14 = arith.maximumf %12, %13 : vector<8x128xf32>
    %c0_12 = arith.constant 0 : index
    %c0_13 = arith.constant 0 : index
    %15 = vector.load %arg6[%c0_12, %c0_13] : memref<128x128xf32, #tpu.memory_space<vmem>>, vector<128x128xf32>
    %cst_14 = arith.constant dense<0.000000e+00> : vector<8x128xf32>
    %16 = tpu.matmul %14, %15, %cst_14 {dimension_numbers = #tpu.dot_dimension_numbers<[1], [0], [0], [1], [0, 0, 1, 1], [], []>} : vector<8x128xf32>, vector<128x128xf32>, vector<8x128xf32> -> vector<8x128xf32>
    %c0_15 = arith.constant 0 : index
    %c0_16 = arith.constant 0 : index
    %17 = vector.load %arg7[%c0_15, %c0_16] : memref<1x128xf32, #tpu.memory_space<vmem>>, vector<1x128xf32>
    %18 = vector.broadcast %17 : vector<1x128xf32> to vector<8x128xf32>
    %19 = arith.addf %16, %18 : vector<8x128xf32>
    %cst_17 = arith.constant 0.000000e+00 : f32
    %20 = vector.broadcast %cst_17 : f32 to vector<8x128xf32>
    %21 = arith.maximumf %19, %20 : vector<8x128xf32>
    %c0_18 = arith.constant 0 : index
    %c0_19 = arith.constant 0 : index
    %22 = vector.load %arg8[%c0_18, %c0_19] : memref<128x128xf32, #tpu.memory_space<vmem>>, vector<128x128xf32>
    %cst_20 = arith.constant dense<0.000000e+00> : vector<8x128xf32>
    %23 = tpu.matmul %21, %22, %cst_20 {dimension_numbers = #tpu.dot_dimension_numbers<[1], [0], [0], [1], [0, 0, 1, 1], [], []>} : vector<8x128xf32>, vector<128x128xf32>, vector<8x128xf32> -> vector<8x128xf32>
    %c0_21 = arith.constant 0 : index
    %c0_22 = arith.constant 0 : index
    %24 = vector.load %arg9[%c0_21, %c0_22] : memref<1x128xf32, #tpu.memory_space<vmem>>, vector<1x128xf32>
    %25 = vector.broadcast %24 : vector<1x128xf32> to vector<8x128xf32>
    %26 = arith.addf %23, %25 : vector<8x128xf32>
    %c0_23 = arith.constant 0 : index
    %c0_24 = arith.constant 0 : index
    %27 = vector.load %arg10[%c0_23, %c0_24] : memref<8x128xf32, #tpu.memory_space<vmem>>, vector<8x128xf32>
    tpu.vector_store %arg10[%c0_23, %c0_24], %26 {strides = array<i32>} : memref<8x128xf32, #tpu.memory_space<vmem>>, vector<8x128xf32>,
    return
  }
  func.func @transform_0(%arg0: i32) -> (i32, i32) {
    %c0_i32 = arith.constant 0 : i32
    %c0_i32_0 = arith.constant 0 : i32
    return %arg0, %c0_i32 : i32, i32
  }
  func.func @transform_1(%arg0: i32) -> (i32, i32) {
    %c0_i32 = arith.constant 0 : i32
    %c0_i32_0 = arith.constant 0 : i32
    %c0_i32_1 = arith.constant 0 : i32
    return %c0_i32, %c0_i32_0 : i32, i32
  }
  func.func @transform_2(%arg0: i32) -> (i32, i32) {
    %c0_i32 = arith.constant 0 : i32
    %c0_i32_0 = arith.constant 0 : i32
    %c0_i32_1 = arith.constant 0 : i32
    return %c0_i32, %c0_i32_0 : i32, i32
  }
  func.func @transform_3(%arg0: i32) -> (i32, i32) {
    %c0_i32 = arith.constant 0 : i32
    %c0_i32_0 = arith.constant 0 : i32
    %c0_i32_1 = arith.constant 0 : i32
    return %c0_i32, %c0_i32_0 : i32, i32
  }
  func.func @transform_4(%arg0: i32) -> (i32, i32) {
    %c0_i32 = arith.constant 0 : i32
    %c0_i32_0 = arith.constant 0 : i32
    %c0_i32_1 = arith.constant 0 : i32
    return %c0_i32, %c0_i32_0 : i32, i32
  }
  func.func @transform_5(%arg0: i32) -> (i32, i32) {
    %c0_i32 = arith.constant 0 : i32
    %c0_i32_0 = arith.constant 0 : i32
    %c0_i32_1 = arith.constant 0 : i32
    return %c0_i32, %c0_i32_0 : i32, i32
  }
  func.func @transform_6(%arg0: i32) -> (i32, i32) {
    %c0_i32 = arith.constant 0 : i32
    %c0_i32_0 = arith.constant 0 : i32
    %c0_i32_1 = arith.constant 0 : i32
    return %c0_i32, %c0_i32_0 : i32, i32
  }
  func.func @transform_7(%arg0: i32) -> (i32, i32) {
    %c0_i32 = arith.constant 0 : i32
    %c0_i32_0 = arith.constant 0 : i32
    %c0_i32_1 = arith.constant 0 : i32
    return %c0_i32, %c0_i32_0 : i32, i32
  }
  func.func @transform_8(%arg0: i32) -> (i32, i32) {
    %c0_i32 = arith.constant 0 : i32
    %c0_i32_0 = arith.constant 0 : i32
    %c0_i32_1 = arith.constant 0 : i32
    return %c0_i32, %c0_i32_0 : i32, i32
  }
  func.func @transform_9(%arg0: i32) -> (i32, i32) {
    %c0_i32 = arith.constant 0 : i32
    %c0_i32_0 = arith.constant 0 : i32
    return %arg0, %c0_i32 : i32, i32
  }
}

</mosaic_0001>

<bundles_post_ra>
// kernel: dueling_qnetwork_forward.1
= control target key start
LH: loop header
LB: loop body
LE: loop exit
PB: predicated region body
PF: predicated region fallthrough
CT: control target
= control target key end

     0   :  { %14 = vsyncpa [#allocation3], 0  ;;  %s828_s0 = inlined_call_operand.vmem [shape: f32[8,8], index: 0, kind: input, shape index: {}]   ;;  %s829_s1 = inlined_call_operand.vmem [shape: f32[8,128], index: 1, kind: input, shape index: {}]   ;;  %s830_s2 = inlined_call_operand.vmem [shape: f32[1,128], index: 2, kind: input, shape index: {}]   ;;  %s831_s3 = inlined_call_operand.hbm [shape: f32[128,128], index: 3, kind: input, shape index: {}]   ;;  %s832_s4 = inlined_call_operand.vmem [shape: f32[1,128], index: 4, kind: input, shape index: {}]   ;;  %s833_s5 = inlined_call_operand.hbm [shape: f32[128,128], index: 5, kind: input, shape index: {}]   ;;  %s834_s6 = inlined_call_operand.vmem [shape: f32[1,128], index: 6, kind: input, shape index: {}]   ;;  %s835_s7 = inlined_call_operand.hbm [shape: f32[128,128], index: 7, kind: input, shape index: {}]   ;;  %s836_s8 = inlined_call_operand.vmem [shape: f32[1,128], index: 8, kind: input, shape index: {}]   ;;  %s837_s9 = inlined_call_operand.vmem [shape: f32[8,128], index: 9, kind: output, shape index: {}]  }
   0x1   :  { %15 = vsyncpa [#allocation5], 0  ;;  %s684_s30 = smov [#allocation4]   ;;  %s685_s11 = smov [#allocation2]  }
   0x2   :  { %s41_s10 = sshll.u32 %s684_s30, 4  ;;  %s27_s12 = sshll.u32 %s685_s11, 4  ;;  %s42_s10 = int_to_ptr.vmem [resolvable:$true] %s41_s10  ;;  %s28_s12 = int_to_ptr.vmem [resolvable:$true] %s27_s12 }
   0x3   :  { %s628_s13 = scalar_lea.vmem %s42_s10, 2048  ;;  %p633_p1 = scmp.lt.s32.totalorder %s42_s10, %s42_s10 }
   0x4   :  { %p629_p0 = scmp.ne.s32.totalorder %s42_s10, %s628_s13  ;;  %p634_p2 = scmp.lt.s32.totalorder %s628_s13, %s628_s13 }
   0x6   :  { %p635_p3 = por %p634_p2, %p633_p1 }
   0x8   :  { %p636_p4 = pnand %p635_p3, %p629_p0 }
   0xa   :  { %639 = shalt.err (!%p636_p4)
}
   0xb   :  { %s686_s14 = smov 128   ;;  %s687_s15 = smov 8  }
   0xc   :  { %47 = dma.hbm_to_vmem [thread:$0]  %s833_s5, 2048, %s42_s10, [#allocation5], %s686_s14, %s686_s14, %s687_s15  }
   0xd   :  { %s648_s18 = scalar_lea.vmem %s28_s12, 2048  ;;  %p653_p6 = scmp.lt.s32.totalorder %s28_s12, %s28_s12 }
   0xe   :  { %p649_p5 = scmp.ne.s32.totalorder %s28_s12, %s648_s18  ;;  %p654_p7 = scmp.lt.s32.totalorder %s648_s18, %s648_s18 }
  0x10   :  { %p655_p8 = por %p654_p7, %p653_p6 }
  0x12   :  { %p656_p9 = pnand %p655_p8, %p649_p5 }
  0x14   :  { %659 = shalt.err (!%p656_p9)
}
  0x15   :  { %33 = dma.hbm_to_vmem [thread:$0]  %s831_s3, 2048, %s28_s12, [#allocation3], %s686_s14, %s686_s14, %s687_s15  }
  0x16   :  { %s688_s21 = smov [#allocation6]  }
  0x17   :  { %s55_s22 = sshll.u32 %s688_s21, 4  ;;  %s56_s22 = int_to_ptr.vmem [resolvable:$true] %s55_s22 }
  0x18   :  { %s668_s23 = scalar_lea.vmem %s56_s22, 2048  ;;  %p673_p11 = scmp.lt.s32.totalorder %s56_s22, %s56_s22 }
  0x19   :  { %p669_p10 = scmp.ne.s32.totalorder %s56_s22, %s668_s23  ;;  %p674_p12 = scmp.lt.s32.totalorder %s668_s23, %s668_s23 }
  0x1b   :  { %p675_p13 = por %p674_p12, %p673_p11 }
  0x1d   :  { %p676_p0 = pnand %p675_p13, %p669_p10 }
  0x1f   :  { %679 = shalt.err (!%p676_p0)
}
  0x20   :  { %61 = dma.hbm_to_vmem [thread:$0]  %s835_s7, 2048, %s56_s22, [#allocation5], %s686_s14, %s686_s14, %s687_s15  }
  0x21   :  { %680 = dma.done.wait [#allocation3], 2048  }
  0x22   :  { %681 = vsyncadd [#allocation3], 4294965248 }
  0x23   :  { %682 = dma.done.wait [#allocation5], 4096  }
  0x24   :  { %683 = vsyncadd [#allocation5], 4294963200  ;;  %v689_v0 = vmov 0.0   ;;  %vm690_vm0 = vmmov 0   ;;  %vm82_vm1 = vcmask 64512   ;;  %v74_v1 = vld [vmem:[%s829_s1] sm:$0xff] }
  0x25   :  { %503 = vmatprep.subr.mxu0 %v689_v0  ;;  %505 = vmatprep.mubr.msk.f32.mxu0 %vm690_vm0, %v689_v0  ;;  %v73_v2 = vld [vmem:[%s828_s0] sm:$0xff]  ;;  %v172_v3 = vld [vmem:[#allocation2 + $0x78] sm:$0xff]  ;;  %v171_v4 = vld [vmem:[#allocation2 + $0x70] sm:$0xff] }
  0x26   :  { %508 = vmatprep.subr.mxu1 %v689_v0  ;;  %540 = vmatprep.mubr.msk.f32.mxu1 %vm690_vm0, %v689_v0  ;;  %v170_v5 = vld [vmem:[#allocation2 + $0x68] sm:$0xff]  ;;  %v169_v6 = vld [vmem:[#allocation2 + $0x60] sm:$0xff]  ;;  %v168_v7 = vld [vmem:[#allocation2 + $0x58] sm:$0xff] }
  0x27   :  { %504 = vmatpush3.msra.mxu0 %v74_v1  ;;  %509 = vmatpush3.msra.mxu1 %v172_v3  ;;  %v167_v8 = vld [vmem:[#allocation2 + $0x50] sm:$0xff]  ;;  %v166_v9 = vld [vmem:[#allocation2 + $0x48] sm:$0xff]  ;;  %v165_v10 = vld [vmem:[#allocation2 + $0x40] sm:$0xff] }
  0x28   :  { %506 = vmatmul.mubr.msk.f32.vlgmr.msra.gmra.mxu0 %vm82_vm1, %v73_v2  ;;  %510 = vmatprep.subr.mxu1 %v689_v0  ;;  %v164_v11 = vld [vmem:[#allocation2 + $0x38] sm:$0xff]  ;;  %v163_v12 = vld [vmem:[#allocation2 + $0x30] sm:$0xff]  ;;  %v162_v13 = vld [vmem:[#allocation2 + $0x28] sm:$0xff] }
  0x29   :  { %511 = vmatpush3.msra.mxu1 %v171_v4  ;;  %543 = vmatprep.subr.mxu0 %v689_v0  ;;  %v161_v14 = vld [vmem:[#allocation2 + $0x20] sm:$0xff]  ;;  %v160_v15 = vld [vmem:[#allocation2 + $0x18] sm:$0xff]  ;;  %v159_v16 = vld [vmem:[#allocation2 + $0x10] sm:$0xff] }
  0x2a   :  { %512 = vmatprep.subr.mxu1 %v689_v0  ;;  %575 = vmatprep.mubr.msk.f32.mxu0 %vm690_vm0, %v689_v0  ;;  %v158_v17 = vld [vmem:[#allocation2 + $0x8] sm:$0xff]  ;;  %v157_v18 = vld [vmem:[#allocation2] sm:$0xff]  ;;  %v266_v19 = vld [vmem:[#allocation4 + $0x78] sm:$0xff] }
  0x2b   :  { %513 = vmatpush3.msra.mxu1 %v170_v5  ;;  %v265_v20 = vld [vmem:[#allocation4 + $0x70] sm:$0xff]  ;;  %544 = vmatpush3.msra.mxu0 %v266_v19  ;;  %v264_v21 = vld [vmem:[#allocation4 + $0x68] sm:$0xff]  ;;  %v263_v22 = vld [vmem:[#allocation4 + $0x60] sm:$0xff] }
  0x2c   :  { %514 = vmatprep.subr.mxu1 %v689_v0  ;;  %545 = vmatprep.subr.mxu0 %v689_v0  ;;  %v262_v23 = vld [vmem:[#allocation4 + $0x58] sm:$0xff]  ;;  %v261_v24 = vld [vmem:[#allocation4 + $0x50] sm:$0xff]  ;;  %v260_v25 = vld [vmem:[#allocation4 + $0x48] sm:$0xff] }
  0x2d   :  { %515 = vmatpush3.msra.mxu1 %v169_v6  ;;  %546 = vmatpush3.msra.mxu0 %v265_v20  ;;  %v259_v26 = vld [vmem:[#allocation4 + $0x40] sm:$0xff]  ;;  %v258_v27 = vld [vmem:[#allocation4 + $0x38] sm:$0xff]  ;;  %v257_v28 = vld [vmem:[#allocation4 + $0x30] sm:$0xff] }
  0x2e   :  { %516 = vmatprep.subr.mxu1 %v689_v0  ;;  %547 = vmatprep.subr.mxu0 %v689_v0  ;;  %v256_v29 = vld [vmem:[#allocation4 + $0x28] sm:$0xff]  ;;  %v255_v30 = vld [vmem:[#allocation4 + $0x20] sm:$0xff]  ;;  %v254_v31 = vld [vmem:[#allocation4 + $0x18] sm:$0xff] }
  0x2f   :  { %517 = vmatpush3.msra.mxu1 %v168_v7  ;;  %548 = vmatpush3.msra.mxu0 %v264_v21  ;;  %v445_v32 = vld [vmem:[%s830_s2] ss:$0 sm:$0xff]  ;;  %v253_v37 = vld [vmem:[#allocation4 + $0x10] sm:$0xff]  ;;  %v252_v38 = vld [vmem:[#allocation4 + $0x8] sm:$0xff] }
  0x30   :  { %518 = vmatprep.subr.mxu1 %v689_v0  ;;  %549 = vmatprep.subr.mxu0 %v689_v0  ;;  %v251_v39 = vld [vmem:[#allocation4] sm:$0xff]  ;;  %v360_v40 = vld [vmem:[#allocation6 + $0x78] sm:$0xff]  ;;  %v359_v41 = vld [vmem:[#allocation6 + $0x70] sm:$0xff] }
  0x31   :  { %519 = vmatpush3.msra.mxu1 %v167_v8  ;;  %550 = vmatpush3.msra.mxu0 %v263_v22  ;;  %v358_v42 = vld [vmem:[#allocation6 + $0x68] sm:$0xff]  ;;  %v357_v43 = vld [vmem:[#allocation6 + $0x60] sm:$0xff]  ;;  %v356_v44 = vld [vmem:[#allocation6 + $0x58] sm:$0xff] }
  0x32   :  { %520 = vmatprep.subr.mxu1 %v689_v0  ;;  %551 = vmatprep.subr.mxu0 %v689_v0  ;;  %v355_v45 = vld [vmem:[#allocation6 + $0x50] sm:$0xff]  ;;  %v354_v46 = vld [vmem:[#allocation6 + $0x48] sm:$0xff]  ;;  %v353_v47 = vld [vmem:[#allocation6 + $0x40] sm:$0xff] }
  0x33   :  { %521 = vmatpush3.msra.mxu1 %v166_v9  ;;  %552 = vmatpush3.msra.mxu0 %v262_v23  ;;  %v352_v48 = vld [vmem:[#allocation6 + $0x38] sm:$0xff]  ;;  %v351_v49 = vld [vmem:[#allocation6 + $0x30] sm:$0xff]  ;;  %v350_v50 = vld [vmem:[#allocation6 + $0x28] sm:$0xff] }
  0x34   :  { %522 = vmatprep.subr.mxu1 %v689_v0  ;;  %553 = vmatprep.subr.mxu0 %v689_v0  ;;  %v349_v51 = vld [vmem:[#allocation6 + $0x20] sm:$0xff]  ;;  %v348_v52 = vld [vmem:[#allocation6 + $0x18] sm:$0xff]  ;;  %v347_v58 = vld [vmem:[#allocation6 + $0x10] sm:$0xff] }
  0x35   :  { %523 = vmatpush3.msra.mxu1 %v165_v10  ;;  %554 = vmatpush3.msra.mxu0 %v261_v24  ;;  %v447_v53 = vld [vmem:[%s832_s4] ss:$0 sm:$0xff]  ;;  %v346_v59 = vld [vmem:[#allocation6 + $0x8] sm:$0xff] }
  0x36   :  { %524 = vmatprep.subr.mxu1 %v689_v0  ;;  %555 = vmatprep.subr.mxu0 %v689_v0  ;;  %v345_v60 = vld [vmem:[#allocation6] sm:$0xff] }
  0x37   :  { %525 = vmatpush3.msra.mxu1 %v164_v11  ;;  %556 = vmatpush3.msra.mxu0 %v260_v25  ;;  %v448_v61 = vld [vmem:[%s834_s6] ss:$0 sm:$0xff] }
  0x38   :  { %526 = vmatprep.subr.mxu1 %v689_v0  ;;  %557 = vmatprep.subr.mxu0 %v689_v0  ;;  %v449_v3 = vld [vmem:[%s836_s8] ss:$0 sm:$0xff] }
  0x39   :  { %527 = vmatpush3.msra.mxu1 %v163_v12  ;;  %558 = vmatpush3.msra.mxu0 %v259_v26 }
  0x3a   :  { %528 = vmatprep.subr.mxu1 %v689_v0  ;;  %559 = vmatprep.subr.mxu0 %v689_v0 }
  0x3b   :  { %529 = vmatpush3.msra.mxu1 %v162_v13  ;;  %560 = vmatpush3.msra.mxu0 %v258_v27 }
  0x3c   :  { %530 = vmatprep.subr.mxu1 %v689_v0  ;;  %561 = vmatprep.subr.mxu0 %v689_v0 }
  0x3d   :  { %531 = vmatpush3.msra.mxu1 %v161_v14  ;;  %562 = vmatpush3.msra.mxu0 %v257_v28 }
  0x3e   :  { %532 = vmatprep.subr.mxu1 %v689_v0  ;;  %563 = vmatprep.subr.mxu0 %v689_v0 }
  0x3f   :  { %533 = vmatpush3.msra.mxu1 %v160_v15  ;;  %564 = vmatpush3.msra.mxu0 %v256_v29 }
  0x40   :  { %534 = vmatprep.subr.mxu1 %v689_v0  ;;  %565 = vmatprep.subr.mxu0 %v689_v0 }
  0x41   :  { %535 = vmatpush3.msra.mxu1 %v159_v16  ;;  %566 = vmatpush3.msra.mxu0 %v255_v30 }
  0x42   :  { %536 = vmatprep.subr.mxu1 %v689_v0  ;;  %567 = vmatprep.subr.mxu0 %v689_v0 }
  0x43   :  { %537 = vmatpush3.msra.mxu1 %v158_v17  ;;  %568 = vmatpush3.msra.mxu0 %v254_v31 }
  0x44   :  { %538 = vmatprep.subr.mxu1 %v689_v0  ;;  %569 = vmatprep.subr.mxu0 %v689_v0 }
  0x45   :  { %539 = vmatpush3.msra.mxu1 %v157_v18  ;;  %570 = vmatpush3.msra.mxu0 %v253_v37 }
  0x46   :  { %578 = vmatprep.subr.mxu1 %v689_v0  ;;  %571 = vmatprep.subr.mxu0 %v689_v0 }
  0x47   :  { %572 = vmatpush3.msra.mxu0 %v252_v38 }
  0x48   :  { %573 = vmatprep.subr.mxu0 %v689_v0 }
  0x49   :  { %574 = vmatpush3.msra.mxu0 %v251_v39 }
  0xe8   :  { %v152_v33 = vpop.f32.mrf.mxu0 }
  0xe9   :  { %v153_v34 = vadd.f32 %v445_v32, %v152_v33 }
  0xea   :  { %v507_v35 = vpop.f32.mrf.mxu0 }
  0xeb   :  { %v156_v36 = vmax.f32 %v153_v34, 0.0 }
  0xed   :  { %541 = vmatmul.mubr.f32.vlgmr.msra.gmra.mxu1 %v156_v36 }
  0xee   :  { %610 = vmatprep.mubr.msk.f32.mxu1 %vm690_vm0, %v689_v0  ;;  %579 = vmatpush3.msra.mxu1 %v360_v40 }
  0xef   :  { %580 = vmatprep.subr.mxu1 %v689_v0 }
  0xf0   :  { %581 = vmatpush3.msra.mxu1 %v359_v41 }
  0xf1   :  { %582 = vmatprep.subr.mxu1 %v689_v0 }
  0xf2   :  { %583 = vmatpush3.msra.mxu1 %v358_v42 }
  0xf3   :  { %584 = vmatprep.subr.mxu1 %v689_v0 }
  0xf4   :  { %585 = vmatpush3.msra.mxu1 %v357_v43 }
  0xf5   :  { %586 = vmatprep.subr.mxu1 %v689_v0 }
  0xf6   :  { %587 = vmatpush3.msra.mxu1 %v356_v44 }
  0xf7   :  { %588 = vmatprep.subr.mxu1 %v689_v0 }
  0xf8   :  { %589 = vmatpush3.msra.mxu1 %v355_v45 }
  0xf9   :  { %590 = vmatprep.subr.mxu1 %v689_v0 }
  0xfa   :  { %591 = vmatpush3.msra.mxu1 %v354_v46 }
  0xfb   :  { %592 = vmatprep.subr.mxu1 %v689_v0 }
  0xfc   :  { %593 = vmatpush3.msra.mxu1 %v353_v47 }
  0xfd   :  { %594 = vmatprep.subr.mxu1 %v689_v0 }
  0xfe   :  { %595 = vmatpush3.msra.mxu1 %v352_v48 }
  0xff   :  { %596 = vmatprep.subr.mxu1 %v689_v0 }
 0x100   :  { %597 = vmatpush3.msra.mxu1 %v351_v49 }
 0x101   :  { %598 = vmatprep.subr.mxu1 %v689_v0 }
 0x102   :  { %599 = vmatpush3.msra.mxu1 %v350_v50 }
 0x103   :  { %600 = vmatprep.subr.mxu1 %v689_v0 }
 0x104   :  { %601 = vmatpush3.msra.mxu1 %v349_v51 }
 0x105   :  { %602 = vmatprep.subr.mxu1 %v689_v0 }
 0x106   :  { %603 = vmatpush3.msra.mxu1 %v348_v52 }
 0x107   :  { %604 = vmatprep.subr.mxu1 %v689_v0 }
 0x108   :  { %605 = vmatpush3.msra.mxu1 %v347_v58 }
 0x109   :  { %606 = vmatprep.subr.mxu1 %v689_v0 }
 0x10a   :  { %607 = vmatpush3.msra.mxu1 %v346_v59 }
 0x10b   :  { %608 = vmatprep.subr.mxu1 %v689_v0 }
 0x10c   :  { %609 = vmatpush3.msra.mxu1 %v345_v60 }
 0x1ad   :  { %v246_v54 = vpop.f32.mrf.mxu1 }
 0x1ae   :  { %v247_v55 = vadd.f32 %v447_v53, %v246_v54 }
 0x1af   :  { %v542_v56 = vpop.f32.mrf.mxu1 }
 0x1b0   :  { %v250_v57 = vmax.f32 %v247_v55, 0.0 }
 0x1b2   :  { %576 = vmatmul.mubr.f32.vlgmr.msra.gmra.mxu0 %v250_v57 }
 0x272   :  { %v340_v62 = vpop.f32.mrf.mxu0 }
 0x273   :  { %v341_v63 = vadd.f32 %v448_v61, %v340_v62 }
 0x274   :  { %v577_v1 = vpop.f32.mrf.mxu0 }
 0x275   :  { %v344_v2 = vmax.f32 %v341_v63, 0.0 }
 0x277   :  { %611 = vmatmul.mubr.f32.vlgmr.msra.gmra.mxu1 %v344_v2 }
 0x337   :  { %v434_v4 = vpop.f32.mrf.mxu1 }
 0x338   :  { %v435_v5 = vadd.f32 %v449_v3, %v434_v4 }
 0x339   :  { %v612_v6 = vpop.f32.mrf.mxu1 }
 0x33a   :  { %438 = vst [vmem:[%s837_s9] sm:$0xff] %v435_v5 }
 0x33b   :  { %443 = vsyncpa [#allocation3], 1 }
 0x33c   :  { %444 = vsyncpa [#allocation5], 1 }

</bundles_post_ra>
